<compile_context>
chip_gen: v6e
topology: v6e:2x2x1
jax: 0.10.0
libtpu: 0.0.40
codegen_flags: <defaults>
</compile_context>

<pallas_src>
import jax
import jax.numpy as jnp
from jax.experimental import pallas as pl
from jax.experimental.pallas import tpu as pltpu

HIDDEN = 64     # fixed by the module definition
SUBLANE = 8


def _round_up(n: int, m: int) -> int:
    return ((n + m - 1) // m) * m


def mlp_kernel(x_ref, w1_ref, b1_ref, w2_ref, b2_ref, o_ref):
    # In-register downcast of x to the MXU operand dtype (wrapper passes x
    # in its native dtype, saving a full HBM cast pass).
    x = x_ref[...].astype(w1_ref.dtype)
    # Layer 1: Linear(input_dim, 64) on the MXU (f32 accumulate), bias + ReLU on VPU.
    h = jnp.dot(x, w1_ref[...], preferred_element_type=jnp.float32)
    h = jnp.maximum(h + b1_ref[...], 0.0)          # b1 is (1, 64) -> broadcasts over rows
    # Layer 2: Linear(64, D_out); cast back to the MXU operand dtype,
    # accumulate in f32, add bias, store the compact (tm, D_out) block.
    y = jnp.dot(h.astype(w2_ref.dtype), w2_ref[...],
                preferred_element_type=jnp.float32)
    o_ref[...] = (y + b2_ref[...]).astype(o_ref.dtype)


def neural_network_adapter_forward(x, w1, b1, w2, b2, *,
                                   compute_dtype=jnp.bfloat16,
                                   block_m=8192):
    """Fused forward pass. x: (B, D_in). Returns (B, D_out) float32.

    compute_dtype: MXU operand dtype (bf16 is native on v5e/v6e/v7x).
    block_m:       max batch tile; actual tile is rounded up to 8 sublanes.
                   Per-step VMEM footprint at 8192 is ~3 MiB double-buffered.
    """
    B, D_in = x.shape
    H = w1.shape[1]
    D_out = w2.shape[1]

    # ---- batch tile: multiple of the 8-sublane granule, capped at block_m ----
    tm = _round_up(min(block_m, _round_up(B, SUBLANE)), SUBLANE)
    grid = (pl.cdiv(B, tm),)   # tail block (if B % tm != 0) is masked by Pallas

    # ---- tiny, VMEM-resident operands: weights in compute_dtype, biases f32 ----
    w1_c = w1.astype(compute_dtype)
    w2_c = w2.astype(compute_dtype)
    b1_2d = b1.reshape(1, H).astype(jnp.float32)
    b2_2d = b2.reshape(1, D_out).astype(jnp.float32)

    w_itemsize = jnp.dtype(compute_dtype).itemsize
    cost = pl.CostEstimate(
        flops=2 * B * (D_in * H + H * D_out),
        transcendentals=0,
        bytes_accessed=(B * D_in * x.dtype.itemsize                 # x in (native dtype)
                        + B * D_out * 4                             # y out (f32, compact)
                        + (D_in * H + H * D_out) * w_itemsize       # weights
                        + (H + D_out) * 4))                         # biases

    out = pl.pallas_call(
        mlp_kernel,
        out_shape=jax.ShapeDtypeStruct((B, D_out), jnp.float32),
        grid=grid,
        in_specs=[
            pl.BlockSpec((tm, D_in), lambda i: (i, 0)),     # x: batch-tiled, native dtype
            pl.BlockSpec((D_in, H), lambda i: (0, 0)),      # w1: VMEM-resident
            pl.BlockSpec((1, H), lambda i: (0, 0)),         # b1: VMEM-resident
            pl.BlockSpec((H, D_out), lambda i: (0, 0)),     # w2: VMEM-resident
            pl.BlockSpec((1, D_out), lambda i: (0, 0)),     # b2: VMEM-resident
        ],
        out_specs=pl.BlockSpec((tm, D_out), lambda i: (i, 0)),   # compact output block
        compiler_params=pltpu.CompilerParams(
            dimension_semantics=("parallel",),      # megacore-shard batch on v7x
            vmem_limit_bytes=32 * 1024 * 1024),     # ample headroom on v5e/v6e/v7x
        cost_estimate=cost,
    )(x, w1_c, b1_2d, w2_c, b2_2d)

    return out


def init_params(key, input_dim, output_dim):
    """Deterministic synthetic init matching nn.Linear's parameter shapes.

    PyTorch nn.Linear stores weight (out, in); we store the transpose
    (in, out) so the kernel does x @ W. Uniform(-1/sqrt(fan_in), 1/sqrt(fan_in))
    mirrors the default nn.Linear init distribution.
    """
    k1, k2, k3, k4 = jax.random.split(key, 4)
    bound1 = 1.0 / jnp.sqrt(float(input_dim))
    bound2 = 1.0 / jnp.sqrt(float(HIDDEN))
    w1 = jax.random.uniform(k1, (input_dim, HIDDEN), jnp.float32, -bound1, bound1)
    b1 = jax.random.uniform(k2, (HIDDEN,), jnp.float32, -bound1, bound1)
    w2 = jax.random.uniform(k3, (HIDDEN, output_dim), jnp.float32, -bound2, bound2)
    b2 = jax.random.uniform(k4, (output_dim,), jnp.float32, -bound2, bound2)
    return w1, b1, w2, b2


def _reference(x, w1, b1, w2, b2):
    return jnp.maximum(x @ w1 + b1, 0.0) @ w2 + b2


if __name__ == "__main__":
    input_dim, output_dim = 32, 16
    key = jax.random.PRNGKey(0)
    k_x, k_p, k_x2 = jax.random.split(key, 3)
    w1, b1, w2, b2 = init_params(k_p, input_dim, output_dim)

    # Case 1: module-sized shape (batch=8) — single grid step, compact output.
    x = jax.random.normal(k_x, (8, input_dim), jnp.float32)
    out = neural_network_adapter_forward(x, w1, b1, w2, b2)
    out = jax.block_until_ready(out)
    ref = _reference(x, w1, b1, w2, b2)
    assert out.shape == (8, output_dim)
    assert jnp.allclose(out, ref, atol=2e-2, rtol=2e-2)

    # Case 2: exercise the batch grid with an uneven batch (masked tail block,
    # no wrapper-side padding of x).
    x2 = jax.random.normal(k_x2, (200, input_dim), jnp.float32)
    out2 = neural_network_adapter_forward(x2, w1, b1, w2, b2, block_m=64)
    out2 = jax.block_until_ready(out2)
    ref2 = _reference(x2, w1, b1, w2, b2)
    assert out2.shape == (200, output_dim)
    assert jnp.allclose(out2, ref2, atol=2e-2, rtol=2e-2)

    # TODO(synk): train_step (Adam optimizer update) is training-time logic,
    # not part of the forward pass; not implemented as a kernel.
    print("KERNEL_OK")
</pallas_src>

<mosaic_0001>
module attributes {stable_mosaic.version = 11 : i64} {
  func.func @mlp_kernel(%arg0: i32, %arg1: memref<8x32xf32, #tpu.memory_space<vmem>>, %arg2: memref<32x64xbf16, #tpu.memory_space<vmem>>, %arg3: memref<1x64xf32, #tpu.memory_space<vmem>>, %arg4: memref<64x16xbf16, #tpu.memory_space<vmem>>, %arg5: memref<1x16xf32, #tpu.memory_space<vmem>>, %arg6: memref<8x16xf32, #tpu.memory_space<vmem>>) attributes {dimension_semantics = [#tpu.dimension_semantics<parallel>], iteration_bounds = array<i64: 1>, scalar_prefetch = 0 : i64, scratch_operands = 0 : i64, tpu.core_type = #tpu.core_type<tc>, window_params = [{transform_indices = @transform_0, window_bounds = array<i64: 8, 32>}, {pipeline_mode = #tpu.pipeline_mode<synchronous>, transform_indices = @transform_1, window_bounds = array<i64: 32, 64>}, {pipeline_mode = #tpu.pipeline_mode<synchronous>, transform_indices = @transform_2, window_bounds = array<i64: 1, 64>}, {pipeline_mode = #tpu.pipeline_mode<synchronous>, transform_indices = @transform_3, window_bounds = array<i64: 64, 16>}, {pipeline_mode = #tpu.pipeline_mode<synchronous>, transform_indices = @transform_4, window_bounds = array<i64: 1, 16>}, {transform_indices = @transform_5, window_bounds = array<i64: 8, 16>}]} {
    %c0 = arith.constant 0 : index
    %c0_0 = arith.constant 0 : index
    %0 = vector.load %arg1[%c0, %c0_0] : memref<8x32xf32, #tpu.memory_space<vmem>>, vector<8x32xf32>
    %1 = arith.truncf %0 : vector<8x32xf32> to vector<8x32xbf16>
    %c0_1 = arith.constant 0 : index
    %c0_2 = arith.constant 0 : index
    %2 = vector.load %arg2[%c0_1, %c0_2] : memref<32x64xbf16, #tpu.memory_space<vmem>>, vector<32x64xbf16>
    %cst = arith.constant dense<0.000000e+00> : vector<8x64xf32>
    %3 = tpu.matmul %1, %2, %cst {dimension_numbers = #tpu.dot_dimension_numbers<[1], [0], [0], [1], [0, 0, 1, 1], [], []>} : vector<8x32xbf16>, vector<32x64xbf16>, vector<8x64xf32> -> vector<8x64xf32>
    %c0_3 = arith.constant 0 : index
    %c0_4 = arith.constant 0 : index
    %4 = vector.load %arg3[%c0_3, %c0_4] : memref<1x64xf32, #tpu.memory_space<vmem>>, vector<1x64xf32>
    %5 = vector.broadcast %4 : vector<1x64xf32> to vector<8x64xf32>
    %6 = arith.addf %3, %5 : vector<8x64xf32>
    %cst_5 = arith.constant 0.000000e+00 : f32
    %7 = vector.broadcast %cst_5 : f32 to vector<8x64xf32>
    %8 = arith.maximumf %6, %7 : vector<8x64xf32>
    %9 = arith.truncf %8 : vector<8x64xf32> to vector<8x64xbf16>
    %c0_6 = arith.constant 0 : index
    %c0_7 = arith.constant 0 : index
    %10 = vector.load %arg4[%c0_6, %c0_7] : memref<64x16xbf16, #tpu.memory_space<vmem>>, vector<64x16xbf16>
    %cst_8 = arith.constant dense<0.000000e+00> : vector<8x16xf32>
    %11 = tpu.matmul %9, %10, %cst_8 {dimension_numbers = #tpu.dot_dimension_numbers<[1], [0], [0], [1], [0, 0, 1, 1], [], []>} : vector<8x64xbf16>, vector<64x16xbf16>, vector<8x16xf32> -> vector<8x16xf32>
    %c0_9 = arith.constant 0 : index
    %c0_10 = arith.constant 0 : index
    %12 = vector.load %arg5[%c0_9, %c0_10] : memref<1x16xf32, #tpu.memory_space<vmem>>, vector<1x16xf32>
    %13 = vector.broadcast %12 : vector<1x16xf32> to vector<8x16xf32>
    %14 = arith.addf %11, %13 : vector<8x16xf32>
    %c0_11 = arith.constant 0 : index
    %c0_12 = arith.constant 0 : index
    %15 = vector.load %arg6[%c0_11, %c0_12] : memref<8x16xf32, #tpu.memory_space<vmem>>, vector<8x16xf32>
    tpu.vector_store %arg6[%c0_11, %c0_12], %14 {strides = array<i32>} : memref<8x16xf32, #tpu.memory_space<vmem>>, vector<8x16xf32>,
    return
  }
  func.func @transform_0(%arg0: i32) -> (i32, i32) {
    %c0_i32 = arith.constant 0 : i32
    %c0_i32_0 = arith.constant 0 : i32
    return %arg0, %c0_i32 : i32, i32
  }
  func.func @transform_1(%arg0: i32) -> (i32, i32) {
    %c0_i32 = arith.constant 0 : i32
    %c0_i32_0 = arith.constant 0 : i32
    %c0_i32_1 = arith.constant 0 : i32
    return %c0_i32, %c0_i32_0 : i32, i32
  }
  func.func @transform_2(%arg0: i32) -> (i32, i32) {
    %c0_i32 = arith.constant 0 : i32
    %c0_i32_0 = arith.constant 0 : i32
    %c0_i32_1 = arith.constant 0 : i32
    return %c0_i32, %c0_i32_0 : i32, i32
  }
  func.func @transform_3(%arg0: i32) -> (i32, i32) {
    %c0_i32 = arith.constant 0 : i32
    %c0_i32_0 = arith.constant 0 : i32
    %c0_i32_1 = arith.constant 0 : i32
    return %c0_i32, %c0_i32_0 : i32, i32
  }
  func.func @transform_4(%arg0: i32) -> (i32, i32) {
    %c0_i32 = arith.constant 0 : i32
    %c0_i32_0 = arith.constant 0 : i32
    %c0_i32_1 = arith.constant 0 : i32
    return %c0_i32, %c0_i32_0 : i32, i32
  }
  func.func @transform_5(%arg0: i32) -> (i32, i32) {
    %c0_i32 = arith.constant 0 : i32
    %c0_i32_0 = arith.constant 0 : i32
    return %arg0, %c0_i32 : i32, i32
  }
}

</mosaic_0001>

<bundles_post_ra>
// kernel: tpu_custom_call.1
= control target key start
LH: loop header
LB: loop body
LE: loop exit
PB: predicated region body
PF: predicated region fallthrough
CT: control target
= control target key end

     0   :  { %v261_v1 = vmov 0.0   ;;  %vm262_vm0 = vmmov 0   ;;  %vm47_vm1 = vcmask 261120   ;;  %s324_s0 = inlined_call_operand.vmem [shape: f32[8,32], index: 0, kind: input, shape index: {}]   ;;  %s325_s1 = inlined_call_operand.vmem [shape: bf16[32,64], index: 1, kind: input, shape index: {}]   ;;  %s326_s2 = inlined_call_operand.vmem [shape: f32[1,64], index: 2, kind: input, shape index: {}]   ;;  %s327_s3 = inlined_call_operand.vmem [shape: bf16[64,16], index: 3, kind: input, shape index: {}]   ;;  %s328_s4 = inlined_call_operand.vmem [shape: f32[1,16], index: 4, kind: input, shape index: {}]   ;;  %s329_s5 = inlined_call_operand.hbm [shape: f32[8,16], index: 5, kind: output, shape index: {}]  }
   0x1   :  { %v233_v0 = vld [vmem:[%s325_s1 + $0x8] sm:$0xff]   ;;  %210 = vmatprep.subr.bf16.mxu0 %v261_v1  ;;  %v234_v2 = vld [vmem:[%s325_s1] sm:$0xff]   ;;  %218 = vmatprep.subr.bf16.mxu1 %v261_v1  ;;  %v235_v4 = vld [vmem:[%s327_s3 + $0x18] sm:$0xff]  }
   0x2   :  { %211 = vmatpush3.bf16.msra.mxu0 %v233_v0  ;;  %214 = vmatprep.mubr.msk.bf16.mxu0 %vm262_vm0, %v261_v1  ;;  %v22_v3 = vld [vmem:[%s324_s0] sm:$0xff]  ;;  %v236_v5 = vld [vmem:[%s327_s3 + $0x10] sm:$0xff]  }
   0x3   :  { %212 = vmatprep.subr.bf16.mxu0 %v261_v1  ;;  %226 = vmatprep.mubr.msk.bf16.mxu1 %vm262_vm0, %v261_v1  ;;  %v23_v6 = vpack.c.bf16 %v22_v3, %v22_v3 }
   0x4   :  { %219 = vmatpush3.bf16.msra.mxu1 %v235_v4 }
   0x5   :  { %220 = vmatprep.subr.bf16.mxu1 %v261_v1 }
   0x6   :  { %213 = vmatpush3.bf16.msra.mxu0 %v234_v2 }
   0x7   :  { %10 = vsyncpa [#allocation3], 0  ;;  %v237_v7 = vld [vmem:[%s327_s3 + $0x8] sm:$0xff]   ;;  %v238_v8 = vld [vmem:[%s327_s3] sm:$0xff]   ;;  %vm132_vm2 = vcmask 523264   ;;  %s263_s9 = smov [#allocation2]  }
   0x8   :  { %221 = vmatpush3.bf16.msra.mxu1 %v236_v5  ;;  %v192_v9 = vld [vmem:[%s326_s2] ss:$0 sm:$0xff]  ;;  %s184_s3 = sshll.u32 %s263_s9, 4  ;;  %vm176_vm3 = vcmask 130048   ;;  %s185_s3 = int_to_ptr.vmem [resolvable:$true] %s184_s3 }
   0x9   :  { %215 = vmatmul.mubr.msk.bf16.vlgmr.msra.gmra.mxu0 %vm47_vm1, %v23_v6  ;;  %222 = vmatprep.subr.bf16.mxu1 %v261_v1  ;;  %v196_v17 = vld [vmem:[%s328_s4] ss:$0 sm:$0xff]  ;;  %s239_s2 = scalar_lea.vmem %s185_s3, 128  ;;  %p244_p1 = scmp.lt.s32.totalorder %s185_s3, %s185_s3 }
   0xa   :  { %p240_p0 = scmp.ne.s32.totalorder %s185_s3, %s239_s2  ;;  %p245_p2 = scmp.lt.s32.totalorder %s239_s2, %s239_s2 }
   0xc   :  { %223 = vmatpush3.bf16.msra.mxu1 %v237_v7  ;;  %p246_p3 = por %p245_p2, %p244_p1 }
   0xd   :  { %224 = vmatprep.subr.bf16.mxu1 %v261_v1 }
   0xe   :  { %p247_p4 = pnand %p246_p3, %p240_p0 }
  0x10   :  { %225 = vmatpush3.bf16.msra.mxu1 %v238_v8 }
  0xc9   :  { %v85_v10 = vpop.f32.mrf.mxu0 }
  0xca   :  { %v86_v11 = vadd.f32 %v192_v9, %v85_v10 }
  0xcb   :  { %v216_v12 = vpop.f32.mrf.mxu0 }
  0xcc   :  { %v91_v13 = vmax.f32 %v86_v11, 0.0 }
  0xcd   :  { %v88_v14 = vpop.f32.mrf.mxu0 }
  0xce   :  { %v92_v15 = vpack.c.bf16 %v91_v13, %v91_v13 }
  0xcf   :  { %v217_v16 = vpop.f32.mrf.mxu0 }
  0xd0   :  { %227 = vmatmul.mubr.msk.bf16.vlgmr.msra.gmra.mxu1 %vm132_vm2, %v92_v15 }
 0x190   :  { %v170_v18 = vpop.f32.mrf.mxu1 }
 0x191   :  { %v171_v19 = vadd.f32 %v196_v17, %v170_v18 }
 0x192   :  { %v228_v20 = vpop.f32.mrf.mxu1 }
 0x193   :  { %177 = vst.msk [vmem:[#allocation2] sm:$0xff] %vm176_vm3, %v171_v19 }
 0x194   :  { %v173_v21 = vpop.f32.mrf.mxu1 }
 0x195   :  { %250 = shalt.err (!%p247_p4)
}
 0x196   :  { %187 = dma.vmem_to_hbm [thread:$0]  %s185_s3, 128, %s329_s5, [#allocation3]   ;;  %v229_v22 = vpop.f32.mrf.mxu1 }
 0x197   :  { %259 = dma.done.wait [#allocation3], 128  }
 0x198   :  { %260 = vsyncadd [#allocation3], 4294967168 }
 0x199   :  { %191 = vsyncpa [#allocation3], 1 }

</bundles_post_ra>
